<compile_context>
chip_gen: v6e
topology: v6e:2x2x1
jax: 0.10.0
libtpu: 0.0.40
codegen_flags: <defaults>
</compile_context>

<pallas_src>
import jax
import jax.numpy as jnp
from jax.experimental import pallas as pl
from jax.experimental.pallas import tpu as pltpu


def _round_up(n, m):
    return ((n + m - 1) // m) * m


def _mlp_kernel(x_ref, w1_ref, b1_ref, w2_ref, b2_ref, o_ref):
    # Cast x to the weight dtype (bf16) immediately before the MXU op; the VPU
    # cast hides under MXU/DMA slack and x travels HBM->VMEM once as f32.
    x = x_ref[...].astype(w1_ref.dtype)               # (TB, 784)
    h = jnp.dot(x, w1_ref[...],
                preferred_element_type=jnp.float32)   # (TB, 128) f32 accumulate
    h = jnp.maximum(h + b1_ref[...], 0.0)             # bias + relu (f32, VPU)
    y = jnp.dot(h, w2_ref[...],
                preferred_element_type=jnp.float32)   # (TB, 10)  f32
    o_ref[...] = (y + b2_ref[...]).astype(o_ref.dtype)


def simple_nn_forward(x, w1, b1, w2, b2, *, block_b=2048):
    """x: (B, 1, 28, 28) or (B, 784) float32. Returns (B, 10) float32.

    NOTE: rows of the last partial batch tile beyond B read undefined data;
    this is safe because every row is independent and Pallas drops the
    out-of-bounds output writes. Do not add cross-row (batch-axis) reductions
    inside the kernel without explicit masking.
    """
    x2d = x.reshape(-1, 28 * 28)                      # same as torch .view(-1, 784)
    B = x2d.shape[0]

    # Batch tile:
    #   * multiple of 16 (satisfies the /8 sublane rule, bf16-friendly),
    #   * never (much) larger than the batch,
    #   * at most ceil(B/2) for big batches -> >=2 grid steps so v7x's two
    #     TensorCores both get work under dimension_semantics=("parallel",),
    #   * >=256 rows when the batch allows, to amortize ~0.35 us/step overhead.
    TB = min(block_b,
             _round_up(B, 16),
             max(256, _round_up(-(-B // 2), 16)))
    grid = (pl.cdiv(B, TB),)                          # partial last block OK

    out = pl.pallas_call(
        _mlp_kernel,
        out_shape=jax.ShapeDtypeStruct((B, 10), jnp.float32),
        grid_spec=pltpu.PrefetchScalarGridSpec(
            num_scalar_prefetch=0,
            grid=grid,
            in_specs=[
                # Streamed per batch tile (double-buffered by Pallas).
                pl.BlockSpec((TB, 784), lambda i: (i, 0)),
                # Weights / biases: constant index_map -> VMEM-resident.
                pl.BlockSpec((784, 128), lambda i: (0, 0)),
                pl.BlockSpec((1, 128), lambda i: (0, 0)),
                pl.BlockSpec((128, 10), lambda i: (0, 0)),
                pl.BlockSpec((1, 10), lambda i: (0, 0)),
            ],
            out_specs=pl.BlockSpec((TB, 10), lambda i: (i, 0)),
        ),
        compiler_params=pltpu.CompilerParams(
            # Batch tiles are independent -> megacore sharding on v7x.
            dimension_semantics=("parallel",),
            # Explicit budget: > v5e's 16 MiB default, < v7x's 64 MiB physical.
            vmem_limit_bytes=32 * 1024 * 1024,
        ),
    )(x2d, w1, b1, w2, b2)

    return out


def init_params(key):
    """Deterministic init matching PyTorch Linear shapes (kaiming-uniform-ish)."""
    k1, k2, k3, k4 = jax.random.split(key, 4)
    # fc1: torch weight shape (128, 784) -> store transposed as (784, 128)
    lim1 = 1.0 / jnp.sqrt(784.0)
    w1 = jax.random.uniform(k1, (784, 128), jnp.float32, -lim1, lim1)
    b1 = jax.random.uniform(k2, (1, 128), jnp.float32, -lim1, lim1)
    # fc2: torch weight shape (10, 128) -> store transposed as (128, 10)
    lim2 = 1.0 / jnp.sqrt(128.0)
    w2 = jax.random.uniform(k3, (128, 10), jnp.float32, -lim2, lim2)
    b2 = jax.random.uniform(k4, (1, 10), jnp.float32, -lim2, lim2)
    return w1, b1, w2, b2


if __name__ == "__main__":
    key = jax.random.PRNGKey(0)
    kx, kp = jax.random.split(key)

    # MNIST-shaped synthetic input, NCHW: batch=8, 1 channel, 28x28
    x = jax.random.normal(kx, (8, 1, 28, 28), dtype=jnp.float32)
    w1, b1, w2, b2 = init_params(kp)

    # Cast w1 once at init/load time (hoisted out of the per-call path);
    # biases and the tiny second-layer weights stay f32.
    w1 = w1.astype(jnp.bfloat16)

    out = simple_nn_forward(x, w1, b1, w2, b2)
    out = jax.block_until_ready(out)

    # Sanity check against a plain-JAX reference with the same bf16 x/w1
    # rounding (kernel accumulates in f32, so results agree tightly).
    # NOTE: bf16 x/w1 differs from an all-f32 torch reference by ~1e-2 rel.
    x2d = x.reshape(-1, 784)
    xb = x2d.astype(jnp.bfloat16).astype(jnp.float32)
    w1f = w1.astype(jnp.float32)
    ref = jnp.maximum(xb @ w1f + b1, 0.0) @ w2 + b2

    assert out.shape == (8, 10)
    assert jnp.allclose(out, ref, atol=2e-4, rtol=2e-4)

    print("KERNEL_OK")
</pallas_src>

<mosaic_0001>
module attributes {stable_mosaic.version = 11 : i64} {
  func.func @_mlp_kernel(%arg0: i32, %arg1: memref<16x784xf32, #tpu.memory_space<vmem>>, %arg2: memref<784x128xbf16, #tpu.memory_space<vmem>>, %arg3: memref<1x128xf32, #tpu.memory_space<vmem>>, %arg4: memref<128x10xf32, #tpu.memory_space<vmem>>, %arg5: memref<1x10xf32, #tpu.memory_space<vmem>>, %arg6: memref<16x10xf32, #tpu.memory_space<vmem>>) attributes {dimension_semantics = [#tpu.dimension_semantics<parallel>], iteration_bounds = array<i64: 1>, scalar_prefetch = 0 : i64, scratch_operands = 0 : i64, tpu.core_type = #tpu.core_type<tc>, window_params = [{transform_indices = @transform_0, window_bounds = array<i64: 16, 784>}, {pipeline_mode = #tpu.pipeline_mode<synchronous>, transform_indices = @transform_1, window_bounds = array<i64: 784, 128>}, {pipeline_mode = #tpu.pipeline_mode<synchronous>, transform_indices = @transform_2, window_bounds = array<i64: 1, 128>}, {pipeline_mode = #tpu.pipeline_mode<synchronous>, transform_indices = @transform_3, window_bounds = array<i64: 128, 10>}, {pipeline_mode = #tpu.pipeline_mode<synchronous>, transform_indices = @transform_4, window_bounds = array<i64: 1, 10>}, {transform_indices = @transform_5, window_bounds = array<i64: 16, 10>}]} {
    %c0 = arith.constant 0 : index
    %c0_0 = arith.constant 0 : index
    %0 = vector.load %arg1[%c0, %c0_0] : memref<16x784xf32, #tpu.memory_space<vmem>>, vector<16x784xf32>
    %1 = arith.truncf %0 : vector<16x784xf32> to vector<16x784xbf16>
    %c0_1 = arith.constant 0 : index
    %c0_2 = arith.constant 0 : index
    %2 = vector.load %arg2[%c0_1, %c0_2] : memref<784x128xbf16, #tpu.memory_space<vmem>>, vector<784x128xbf16>
    %cst = arith.constant dense<0.000000e+00> : vector<16x128xf32>
    %3 = tpu.matmul %1, %2, %cst {dimension_numbers = #tpu.dot_dimension_numbers<[1], [0], [0], [1], [0, 0, 1, 1], [], []>} : vector<16x784xbf16>, vector<784x128xbf16>, vector<16x128xf32> -> vector<16x128xf32>
    %c0_3 = arith.constant 0 : index
    %c0_4 = arith.constant 0 : index
    %4 = vector.load %arg3[%c0_3, %c0_4] : memref<1x128xf32, #tpu.memory_space<vmem>>, vector<1x128xf32>
    %5 = vector.broadcast %4 : vector<1x128xf32> to vector<16x128xf32>
    %6 = arith.addf %3, %5 : vector<16x128xf32>
    %cst_5 = arith.constant 0.000000e+00 : f32
    %7 = vector.broadcast %cst_5 : f32 to vector<16x128xf32>
    %8 = arith.maximumf %6, %7 : vector<16x128xf32>
    %c0_6 = arith.constant 0 : index
    %c0_7 = arith.constant 0 : index
    %9 = vector.load %arg4[%c0_6, %c0_7] : memref<128x10xf32, #tpu.memory_space<vmem>>, vector<128x10xf32>
    %cst_8 = arith.constant dense<0.000000e+00> : vector<16x10xf32>
    %10 = tpu.matmul %8, %9, %cst_8 {dimension_numbers = #tpu.dot_dimension_numbers<[1], [0], [0], [1], [0, 0, 1, 1], [], []>} : vector<16x128xf32>, vector<128x10xf32>, vector<16x10xf32> -> vector<16x10xf32>
    %c0_9 = arith.constant 0 : index
    %c0_10 = arith.constant 0 : index
    %11 = vector.load %arg5[%c0_9, %c0_10] : memref<1x10xf32, #tpu.memory_space<vmem>>, vector<1x10xf32>
    %12 = vector.broadcast %11 : vector<1x10xf32> to vector<16x10xf32>
    %13 = arith.addf %10, %12 : vector<16x10xf32>
    %c0_11 = arith.constant 0 : index
    %c0_12 = arith.constant 0 : index
    %14 = vector.load %arg6[%c0_11, %c0_12] : memref<16x10xf32, #tpu.memory_space<vmem>>, vector<16x10xf32>
    tpu.vector_store %arg6[%c0_11, %c0_12], %13 {strides = array<i32>} : memref<16x10xf32, #tpu.memory_space<vmem>>, vector<16x10xf32>,
    return
  }
  func.func @transform_0(%arg0: i32) -> (i32, i32) {
    %c0_i32 = arith.constant 0 : i32
    %c0_i32_0 = arith.constant 0 : i32
    return %arg0, %c0_i32 : i32, i32
  }
  func.func @transform_1(%arg0: i32) -> (i32, i32) {
    %c0_i32 = arith.constant 0 : i32
    %c0_i32_0 = arith.constant 0 : i32
    %c0_i32_1 = arith.constant 0 : i32
    return %c0_i32, %c0_i32_0 : i32, i32
  }
  func.func @transform_2(%arg0: i32) -> (i32, i32) {
    %c0_i32 = arith.constant 0 : i32
    %c0_i32_0 = arith.constant 0 : i32
    %c0_i32_1 = arith.constant 0 : i32
    return %c0_i32, %c0_i32_0 : i32, i32
  }
  func.func @transform_3(%arg0: i32) -> (i32, i32) {
    %c0_i32 = arith.constant 0 : i32
    %c0_i32_0 = arith.constant 0 : i32
    %c0_i32_1 = arith.constant 0 : i32
    return %c0_i32, %c0_i32_0 : i32, i32
  }
  func.func @transform_4(%arg0: i32) -> (i32, i32) {
    %c0_i32 = arith.constant 0 : i32
    %c0_i32_0 = arith.constant 0 : i32
    %c0_i32_1 = arith.constant 0 : i32
    return %c0_i32, %c0_i32_0 : i32, i32
  }
  func.func @transform_5(%arg0: i32) -> (i32, i32) {
    %c0_i32 = arith.constant 0 : i32
    %c0_i32_0 = arith.constant 0 : i32
    return %arg0, %c0_i32 : i32, i32
  }
}

</mosaic_0001>

<bundles_post_ra>
// kernel: tpu_custom_call.1
= control target key start
LH: loop header
LB: loop body
LE: loop exit
PB: predicated region body
PF: predicated region fallthrough
CT: control target
= control target key end

     0   :  { %10 = vsyncpa [#allocation3], 0  ;;  %s1164_s0 = inlined_call_operand.vmem [shape: f32[8,784], index: 0, kind: input, shape index: {}]   ;;  %s1165_s1 = inlined_call_operand.hbm [shape: bf16[784,128], index: 1, kind: input, shape index: {}]   ;;  %s1166_s2 = inlined_call_operand.vmem [shape: f32[1,128], index: 2, kind: input, shape index: {}]   ;;  %s1167_s3 = inlined_call_operand.vmem [shape: f32[128,10], index: 3, kind: input, shape index: {}]   ;;  %s1168_s4 = inlined_call_operand.vmem [shape: f32[1,10], index: 4, kind: input, shape index: {}]   ;;  %s1169_s5 = inlined_call_operand.hbm [shape: f32[8,10], index: 5, kind: output, shape index: {}]  }
   0x1   :  { %11 = vsyncpa [#allocation4], 0  ;;  %s1024_s18 = smov [#allocation2]  }
   0x2   :  { %s19_s19 = sshll.u32 %s1024_s18, 4  ;;  %s20_s19 = int_to_ptr.vmem [resolvable:$true] %s19_s19 }
   0x3   :  { %s988_s20 = scalar_lea.vmem %s20_s19, 6272  ;;  %p993_p1 = scmp.lt.s32.totalorder %s20_s19, %s20_s19 }
   0x4   :  { %p989_p0 = scmp.ne.s32.totalorder %s20_s19, %s988_s20  ;;  %p994_p2 = scmp.lt.s32.totalorder %s988_s20, %s988_s20 }
   0x6   :  { %p995_p3 = por %p994_p2, %p993_p1 }
   0x8   :  { %p996_p4 = pnand %p995_p3, %p989_p0 }
   0xa   :  { %999 = shalt.err (!%p996_p4)
}
   0xb   :  { %s1025_s21 = smov 64   ;;  %s1026_s22 = smov 4  }
   0xc   :  { %25 = dma.hbm_to_vmem [thread:$0]  %s1165_s1, 6272, %s20_s19, [#allocation3], %s1025_s21, %s1025_s21, %s1026_s22  }
   0xd   :  { %1020 = dma.done.wait [#allocation3], 6272  }
   0xe   :  { %1021 = vsyncadd [#allocation3], 4294961024  ;;  %v931_v0 = vld [vmem:[#allocation2 + $0x78] sm:$0xff]   ;;  %v935_v4 = vld [vmem:[#allocation2 + $0x70] sm:$0xff]   ;;  %v1027_v43 = vmov 0.0   ;;  %vm1028_vm0 = vmmov 0  }
   0xf   :  { %v932_v1 = vld [vmem:[#allocation2 + $0x38] sm:$0xff]   ;;  %796 = vmatprep.subr.bf16.mxu0 %v931_v0  ;;  %v936_v5 = vld [vmem:[#allocation2 + $0x30] sm:$0xff]   ;;  %v939_v8 = vld [vmem:[#allocation2 + $0x68] sm:$0xff]   ;;  %vm456_vm1 = vcmask 130048   ;;  %vm724_vm2 = vcmask 80896  }
  0x10   :  { %v933_v2 = vld [vmem:[#allocation2 + $0xf8] sm:$0xff]   ;;  %797 = vmatpush3.bf16.msra.mxu0 %v932_v1  ;;  %v937_v6 = vld [vmem:[#allocation2 + $0xf0] sm:$0xff]   ;;  %v940_v9 = vld [vmem:[#allocation2 + $0x28] sm:$0xff]  }
  0x11   :  { %v934_v3 = vld [vmem:[#allocation2 + $0xb8] sm:$0xff]   ;;  %818 = vmatprep.subr.bf16.mxu1 %v933_v2  ;;  %798 = vmatprep.subr.bf16.mxu0 %v935_v4  ;;  %v938_v7 = vld [vmem:[#allocation2 + $0xb0] sm:$0xff]   ;;  %v941_v10 = vld [vmem:[#allocation2 + $0xe8] sm:$0xff]  }
  0x12   :  { %819 = vmatpush3.bf16.msra.mxu1 %v934_v3  ;;  %v942_v11 = vld [vmem:[#allocation2 + $0xa8] sm:$0xff]   ;;  %v943_v12 = vld [vmem:[#allocation2 + $0x60] sm:$0xff]   ;;  %v947_v16 = vld [vmem:[#allocation2 + $0x58] sm:$0xff]  }
  0x13   :  { %820 = vmatprep.subr.bf16.mxu1 %v937_v6  ;;  %v944_v13 = vld [vmem:[#allocation2 + $0x20] sm:$0xff]   ;;  %v948_v17 = vld [vmem:[#allocation2 + $0x18] sm:$0xff]   ;;  %v951_v20 = vld [vmem:[#allocation2 + $0x50] sm:$0xff]  }
  0x14   :  { %799 = vmatpush3.bf16.msra.mxu0 %v936_v5  ;;  %v945_v14 = vld [vmem:[#allocation2 + $0xe0] sm:$0xff]   ;;  %v949_v18 = vld [vmem:[#allocation2 + $0xd8] sm:$0xff]   ;;  %v952_v21 = vld [vmem:[#allocation2 + $0x10] sm:$0xff]  }
  0x15   :  { %800 = vmatprep.subr.bf16.mxu0 %v939_v8  ;;  %v946_v15 = vld [vmem:[#allocation2 + $0xa0] sm:$0xff]   ;;  %v950_v19 = vld [vmem:[#allocation2 + $0x98] sm:$0xff]   ;;  %v953_v22 = vld [vmem:[#allocation2 + $0xd0] sm:$0xff]  }
  0x16   :  { %821 = vmatpush3.bf16.msra.mxu1 %v938_v7  ;;  %v954_v23 = vld [vmem:[#allocation2 + $0x90] sm:$0xff]   ;;  %v955_v24 = vld [vmem:[#allocation2 + $0x48] sm:$0xff]   ;;  %v959_v28 = vld [vmem:[#allocation2 + $0x40] sm:$0xff]  }
  0x17   :  { %822 = vmatprep.subr.bf16.mxu1 %v941_v10  ;;  %v956_v25 = vld [vmem:[#allocation2 + $0x8] sm:$0xff]   ;;  %v960_v29 = vld [vmem:[#allocation2] sm:$0xff]   ;;  %v43_v36 = vld [vmem:[%s1164_s0 + $0x38] sm:$0xff] }
  0x18   :  { %801 = vmatpush3.bf16.msra.mxu0 %v940_v9  ;;  %v957_v26 = vld [vmem:[#allocation2 + $0xc8] sm:$0xff]   ;;  %v961_v30 = vld [vmem:[#allocation2 + $0xc0] sm:$0xff]   ;;  %v963_v38 = vld [vmem:[#allocation2 + $0x178] sm:$0xff]  }
  0x19   :  { %802 = vmatprep.subr.bf16.mxu0 %v943_v12  ;;  %v958_v27 = vld [vmem:[#allocation2 + $0x88] sm:$0xff]   ;;  %v44_v32 = vld [vmem:[%s1164_s0 + $0x40] sm:$0xff]  ;;  %v39_v39 = vld [vmem:[%s1164_s0 + $0x18] sm:$0xff] }
  0x1a   :  { %823 = vmatpush3.bf16.msra.mxu1 %v942_v11  ;;  %v37_v31 = vld [vmem:[%s1164_s0 + $0x8] sm:$0xff]  ;;  %v962_v34 = vld [vmem:[#allocation2 + $0x80] sm:$0xff]   ;;  %v46_v40 = vld [vmem:[%s1164_s0 + $0x50] sm:$0xff] }
  0x1b   :  { %824 = vmatprep.subr.bf16.mxu1 %v945_v14  ;;  %v51_v33 = vpack.c.bf16 %v44_v32, %v37_v31  ;;  %v36_v35 = vld [vmem:[%s1164_s0] sm:$0xff]  ;;  %v53_v41 = vpack.c.bf16 %v46_v40, %v39_v39  ;;  %v964_v42 = vld [vmem:[#allocation2 + $0x138] sm:$0xff]   ;;  %v38_v44 = vld [vmem:[%s1164_s0 + $0x10] sm:$0xff] }
  0x1c   :  { %803 = vmatpush3.bf16.msra.mxu0 %v944_v13  ;;  %v50_v37 = vpack.c.bf16 %v43_v36, %v36_v35  ;;  %v45_v45 = vld [vmem:[%s1164_s0 + $0x48] sm:$0xff]  ;;  %v965_v47 = vld [vmem:[#allocation2 + $0x170] sm:$0xff]   ;;  %v969_v51 = vld [vmem:[#allocation2 + $0x160] sm:$0xff]  }
  0x1d   :  { %804 = vmatprep.subr.bf16.mxu0 %v947_v16  ;;  %492 = vmatprep.mubr.bf16.mxu0 %v51_v33  ;;  %v52_v46 = vpack.c.bf16 %v45_v45, %v38_v44  ;;  %v966_v48 = vld [vmem:[#allocation2 + $0x130] sm:$0xff]   ;;  %v967_v49 = vld [vmem:[#allocation2 + $0x168] sm:$0xff]   ;;  %v970_v52 = vld [vmem:[#allocation2 + $0x120] sm:$0xff]  }
  0x1e   :  { %825 = vmatpush3.bf16.msra.mxu1 %v946_v15  ;;  %533 = vmatprep.mubr.bf16.mxu1 %v53_v41  ;;  %v968_v50 = vld [vmem:[#allocation2 + $0x128] sm:$0xff]   ;;  %v971_v53 = vld [vmem:[#allocation2 + $0x158] sm:$0xff]   ;;  %v973_v55 = vld [vmem:[#allocation2 + $0x150] sm:$0xff]  }
  0x1f   :  { %826 = vmatprep.subr.bf16.mxu1 %v949_v18  ;;  %v972_v54 = vld [vmem:[#allocation2 + $0x118] sm:$0xff]   ;;  %v979_v56 = vld [vmem:[#allocation2 + $0x180] sm:$0xff]   ;;  %v41_v57 = vld [vmem:[%s1164_s0 + $0x28] sm:$0xff] }
  0x20   :  { %805 = vmatpush3.bf16.msra.mxu0 %v948_v17  ;;  %v48_v58 = vld [vmem:[%s1164_s0 + $0x60] sm:$0xff]  ;;  %v974_v59 = vld [vmem:[#allocation2 + $0x110] sm:$0xff]   ;;  %v49_v62 = vld [vmem:[%s1164_s0 + $0x68] sm:$0xff] }
  0x21   :  { %806 = vmatprep.subr.bf16.mxu0 %v951_v20  ;;  %v55_v60 = vpack.c.bf16 %v48_v58, %v41_v57  ;;  %v42_v61 = vld [vmem:[%s1164_s0 + $0x30] sm:$0xff]  ;;  %v975_v63 = vld [vmem:[#allocation2 + $0x148] sm:$0xff]   ;;  %v977_v2 = vld [vmem:[#allocation2 + $0x140] sm:$0xff]  }
  0x22   :  { %827 = vmatpush3.bf16.msra.mxu1 %v950_v19  ;;  %v56_v0 = vpack.c.bf16 %v49_v62, %v42_v61  ;;  %v976_v1 = vld [vmem:[#allocation2 + $0x108] sm:$0xff]   ;;  %v978_v3 = vld [vmem:[#allocation2 + $0x100] sm:$0xff]   ;;  %v47_v5 = vld [vmem:[%s1164_s0 + $0x58] sm:$0xff] }
  0x23   :  { %828 = vmatprep.subr.bf16.mxu1 %v953_v22  ;;  %v40_v4 = vld [vmem:[%s1164_s0 + $0x20] sm:$0xff]  ;;  %v641_v7 = vld [vmem:[%s1167_s3 + $0x78] sm:$0xff]  ;;  %v640_v8 = vld [vmem:[%s1167_s3 + $0x70] sm:$0xff] }
  0x24   :  { %807 = vmatpush3.bf16.msra.mxu0 %v952_v21  ;;  %v54_v6 = vpack.c.bf16 %v47_v5, %v40_v4  ;;  %v639_v9 = vld [vmem:[%s1167_s3 + $0x68] sm:$0xff]  ;;  %v638_v10 = vld [vmem:[%s1167_s3 + $0x60] sm:$0xff]  ;;  %v637_v11 = vld [vmem:[%s1167_s3 + $0x58] sm:$0xff] }
  0x25   :  { %808 = vmatprep.subr.bf16.mxu0 %v955_v24  ;;  %v636_v12 = vld [vmem:[%s1167_s3 + $0x50] sm:$0xff]  ;;  %v635_v13 = vld [vmem:[%s1167_s3 + $0x48] sm:$0xff]  ;;  %v634_v14 = vld [vmem:[%s1167_s3 + $0x40] sm:$0xff] }
  0x26   :  { %829 = vmatpush3.bf16.msra.mxu1 %v954_v23  ;;  %v633_v15 = vld [vmem:[%s1167_s3 + $0x38] sm:$0xff]  ;;  %v632_v16 = vld [vmem:[%s1167_s3 + $0x30] sm:$0xff]  ;;  %v631_v17 = vld [vmem:[%s1167_s3 + $0x28] sm:$0xff] }
  0x27   :  { %830 = vmatprep.subr.bf16.mxu1 %v957_v26  ;;  %v630_v18 = vld [vmem:[%s1167_s3 + $0x20] sm:$0xff]  ;;  %v629_v19 = vld [vmem:[%s1167_s3 + $0x18] sm:$0xff]  ;;  %v628_v20 = vld [vmem:[%s1167_s3 + $0x10] sm:$0xff] }
  0x28   :  { %809 = vmatpush3.bf16.msra.mxu0 %v956_v25  ;;  %v627_v21 = vld [vmem:[%s1167_s3 + $0x8] sm:$0xff]  ;;  %v626_v22 = vld [vmem:[%s1167_s3] sm:$0xff] }
  0x29   :  { %810 = vmatprep.subr.bf16.mxu0 %v959_v28  ;;  %v744_v35 = vld [vmem:[%s1166_s2] ss:$0 sm:$0xff] }
  0x2a   :  { %831 = vmatpush3.bf16.msra.mxu1 %v958_v27 }
  0x2b   :  { %832 = vmatprep.subr.bf16.mxu1 %v961_v30 }
  0x2c   :  { %811 = vmatpush3.bf16.msra.mxu0 %v960_v29 }
  0x2d   :  { %840 = vmatprep.subr.bf16.mxu0 %v963_v38 }
  0x2e   :  { %833 = vmatpush3.bf16.msra.mxu1 %v962_v34 }
  0x2f   :  { %882 = vmatprep.subr.bf16.mxu1 %v1027_v43  ;;  %493 = vmatmul.mubr.bf16.vlgmr.msra.gmra.mxu0 %v50_v37 }
  0x30   :  { %841 = vmatpush3.bf16.msra.mxu0 %v964_v42  ;;  %574 = vmatprep.mubr.bf16.mxu0 %v55_v60 }
  0x31   :  { %534 = vmatmul.mubr.bf16.vlgmr.msra.gmra.mxu1 %v52_v46  ;;  %842 = vmatprep.subr.bf16.mxu0 %v965_v47 }
  0x32   :  { %884 = vmatprep.mubr.msk.bf16.mxu1 %vm1028_vm0, %v1027_v43  ;;  %883 = vmatpush3.bf16.msra.mxu1 %v979_v56  ;;  %v795_v56 = vld [vmem:[%s1168_s4] ss:$0 sm:$0xff] }
  0x33   :  { %888 = vmatprep.subr.mxu1 %v641_v7 }
  0x34   :  { %843 = vmatpush3.bf16.msra.mxu0 %v966_v48 }
  0x35   :  { %844 = vmatprep.subr.bf16.mxu0 %v967_v49 }
  0x38   :  { %845 = vmatpush3.bf16.msra.mxu0 %v968_v50 }
  0x39   :  { %846 = vmatprep.subr.bf16.mxu0 %v969_v51  ;;  %885 = vmatmul.mubr.msk.bf16.vlgmr.msra.gmra.mxu1 %vm456_vm1, %v56_v0 }
  0x3a   :  { %889 = vmatpush3.msra.mxu1 %v641_v7 }
  0x3b   :  { %890 = vmatprep.subr.mxu1 %v640_v8 }
  0x3c   :  { %847 = vmatpush3.bf16.msra.mxu0 %v970_v52  ;;  %891 = vmatpush3.msra.mxu1 %v640_v8 }
  0x3d   :  { %848 = vmatprep.subr.bf16.mxu0 %v971_v53  ;;  %892 = vmatprep.subr.mxu1 %v639_v9 }
  0x3e   :  { %893 = vmatpush3.msra.mxu1 %v639_v9 }
  0x3f   :  { %894 = vmatprep.subr.mxu1 %v638_v10 }
  0x40   :  { %849 = vmatpush3.bf16.msra.mxu0 %v972_v54  ;;  %895 = vmatpush3.msra.mxu1 %v638_v10 }
  0x41   :  { %850 = vmatprep.subr.bf16.mxu0 %v973_v55  ;;  %896 = vmatprep.subr.mxu1 %v637_v11 }
  0x42   :  { %897 = vmatpush3.msra.mxu1 %v637_v11 }
  0x43   :  { %898 = vmatprep.subr.mxu1 %v636_v12 }
  0x44   :  { %851 = vmatpush3.bf16.msra.mxu0 %v974_v59  ;;  %899 = vmatpush3.msra.mxu1 %v636_v12 }
  0x45   :  { %852 = vmatprep.subr.bf16.mxu0 %v975_v63  ;;  %900 = vmatprep.subr.mxu1 %v635_v13 }
  0x46   :  { %901 = vmatpush3.msra.mxu1 %v635_v13 }
  0x47   :  { %902 = vmatprep.subr.mxu1 %v634_v14 }
  0x48   :  { %853 = vmatpush3.bf16.msra.mxu0 %v976_v1  ;;  %903 = vmatpush3.msra.mxu1 %v634_v14 }
  0x49   :  { %854 = vmatprep.subr.bf16.mxu0 %v977_v2  ;;  %904 = vmatprep.subr.mxu1 %v633_v15 }
  0x4a   :  { %905 = vmatpush3.msra.mxu1 %v633_v15 }
  0x4b   :  { %906 = vmatprep.subr.mxu1 %v632_v16 }
  0x4c   :  { %855 = vmatpush3.bf16.msra.mxu0 %v978_v3  ;;  %907 = vmatpush3.msra.mxu1 %v632_v16 }
  0x4d   :  { %908 = vmatprep.subr.mxu1 %v631_v17 }
  0x4e   :  { %909 = vmatpush3.msra.mxu1 %v631_v17 }
  0x4f   :  { %575 = vmatmul.mubr.bf16.vlgmr.msra.gmra.mxu0 %v54_v6  ;;  %910 = vmatprep.subr.mxu1 %v630_v18 }
  0x50   :  { %911 = vmatpush3.msra.mxu1 %v630_v18 }
  0x51   :  { %912 = vmatprep.subr.mxu1 %v629_v19 }
  0x52   :  { %913 = vmatpush3.msra.mxu1 %v629_v19 }
  0x53   :  { %914 = vmatprep.subr.mxu1 %v628_v20 }
  0x54   :  { %915 = vmatpush3.msra.mxu1 %v628_v20 }
  0x55   :  { %916 = vmatprep.subr.mxu1 %v627_v21 }
  0x56   :  { %917 = vmatpush3.msra.mxu1 %v627_v21 }
  0x57   :  { %918 = vmatprep.subr.mxu1 %v626_v22 }
  0x58   :  { %919 = vmatpush3.msra.mxu1 %v626_v22 }
  0xef   :  { %v812_v26 = vpop.f32.mrf.mxu0 }
  0xf1   :  { %v834_v23 = vpop.f32.mrf.mxu1  ;;  %v813_v28 = vpop.f32.mrf.mxu0 }
  0xf2   :  { %v814_v34 = vadd.f32 %v813_v28, %v812_v26 }
  0xf3   :  { %v835_v24 = vpop.f32.mrf.mxu1  ;;  %v815_v31 = vpop.f32.mrf.mxu0 }
  0xf4   :  { %v495_v37 = vadd.f32 %v814_v34, %v744_v35  ;;  %v836_v38 = vadd.f32 %v835_v24, %v834_v23 }
  0xf5   :  { %v837_v25 = vpop.f32.mrf.mxu1  ;;  %v816_v36 = vpop.f32.mrf.mxu0 }
  0xf6   :  { %v817_v39 = vadd.f32 %v816_v36, %v815_v31  ;;  %v536_v42 = vadd.f32 %v836_v38, %v495_v37 }
  0xf7   :  { %v838_v27 = vpop.f32.mrf.mxu1 }
  0xf8   :  { %v498_v43 = vadd.f32 %v817_v39, %v744_v35  ;;  %v839_v44 = vadd.f32 %v838_v27, %v837_v25 }
  0xf9   :  { %v617_v29 = vpop.f32.mrf.mxu1 }
  0xfa   :  { %v539_v49 = vadd.f32 %v839_v44, %v498_v43 }
  0xfb   :  { %v886_v30 = vpop.f32.mrf.mxu1 }
  0xfd   :  { %v620_v32 = vpop.f32.mrf.mxu1 }
  0xff   :  { %v887_v33 = vpop.f32.mrf.mxu1 }
 0x10f   :  { %v856_v40 = vpop.f32.mrf.mxu0 }
 0x111   :  { %v857_v41 = vpop.f32.mrf.mxu0 }
 0x112   :  { %v858_v45 = vadd.f32 %v857_v41, %v856_v40 }
 0x113   :  { %v859_v46 = vpop.f32.mrf.mxu0 }
 0x114   :  { %v577_v47 = vadd.f32 %v858_v45, %v536_v42 }
 0x115   :  { %v860_v48 = vpop.f32.mrf.mxu0 }
 0x116   :  { %v861_v50 = vadd.f32 %v860_v48, %v859_v46  ;;  %v618_v51 = vadd.f32 %v617_v29, %v577_v47 }
 0x118   :  { %v580_v52 = vadd.f32 %v861_v50, %v539_v49  ;;  %v624_v53 = vmax.f32 %v618_v51, 0.0 }
 0x11a   :  { %v621_v54 = vadd.f32 %v620_v32, %v580_v52  ;;  %920 = vmatprep.mubr.f32.mxu1 %v624_v53 }
 0x11c   :  { %v625_v55 = vmax.f32 %v621_v54, 0.0 }
 0x11e   :  { %921 = vmatmul.mubr.f32.vlgmr.msra.gmra.mxu1 %v625_v55 }
 0x1de   :  { %v922_v57 = vpop.f32.mrf.mxu1 }
 0x1df   :  { %v721_v58 = vadd.f32 %v922_v57, %v795_v56 }
 0x1e0   :  { %v715_v59 = vpop.f32.mrf.mxu1 }
 0x1e1   :  { %726 = vst.msk [vmem:[#allocation5 + $0x8] sm:$0xff] %vm724_vm2, %v721_v58  ;;  %v716_v60 = vadd.f32 %v795_v56, %v715_v59 }
 0x1e3   :  { %725 = vst.msk [vmem:[#allocation5] sm:$0xff] %vm724_vm2, %v716_v60 }
 0x1e4   :  { %731 = vsyncadd [#allocation4], 128  ;;  %s1029_s7 = smov [#allocation5]  }
 0x1e5   :  { %s732_s8 = sshll.u32 %s1029_s7, 4  ;;  %s733_s8 = int_to_ptr.vmem [resolvable:$true] %s732_s8 }
 0x1e6   :  { %s1000_s9 = scalar_lea.vmem %s733_s8, 128  ;;  %s1004_s10 = scalar_lea.vmem %s733_s8, 256 }
 0x1e7   :  { %p1001_p5 = scmp.ne.s32.totalorder %s733_s8, %s1000_s9  ;;  %p1005_p6 = scmp.lt.s32.totalorder %s733_s8, %s733_s8 }
 0x1e8   :  { %p1006_p7 = scmp.lt.s32.totalorder %s1004_s10, %s1000_s9 }
 0x1ea   :  { %p1007_p8 = por %p1006_p7, %p1005_p6 }
 0x1ec   :  { %p1008_p9 = pnand %p1007_p8, %p1001_p5 }
 0x1ee   :  { %1011 = shalt.err (!%p1008_p9)
}
 0x1ef   :  { %s1030_s4 = smov 128   ;;  %s1031_s11 = smov 8  }
 0x1f0   :  { %738 = dma.vmem_to_hbm [thread:$0]  %s733_s8, 128, %s1169_s5, [#allocation4], %s1030_s4, %s1030_s4, %s1031_s11  }
 0x1f1   :  { %1022 = dma.done.wait [#allocation4], 256  }
 0x1f2   :  { %1023 = vsyncadd [#allocation4], 4294967040 }
 0x1f3   :  { %742 = vsyncpa [#allocation3], 1 }
 0x1f4   :  { %743 = vsyncpa [#allocation4], 1 }

</bundles_post_ra>
